<compile_context>
chip_gen: v5e
topology: v5e:2x2
jax: 0.10.0
libtpu: 0.0.40
codegen_flags: <defaults>
</compile_context>

<pallas_src>
import functools

import jax
import jax.numpy as jnp
from jax import lax
from jax.experimental import pallas as pl
from jax.experimental.pallas import tpu as pltpu


def _cdiv(a, b):
    return -(-a // b)


def _focal_loss_kernel(logits_ref, targets_ref, wt_ref, out_ref, acc_ref, *,
                       gamma, n_total, tile, lane_dense):
    """One grid step over `tile` samples.

    lane_dense=True : logits block is [C, tile]   (samples on the lane axis)
    lane_dense=False: logits block is [tile, C]   (classes on the lane axis)
    """
    step = pl.program_id(0)
    class_axis = 0 if lane_dense else 1
    sample_axis = 1 - class_axis

    @pl.when(step == 0)
    def _init():
        acc_ref[...] = jnp.zeros_like(acc_ref)
        out_ref[...] = jnp.zeros_like(out_ref)

    x = logits_ref[...].astype(jnp.float32)      # native dtype on the wire
    t = targets_ref[...]                         # int32, [1, tile] / [tile, 1]
    w_t = wt_ref[...]                            # f32,   [1, tile] / [tile, 1]

    # Numerically stable log-softmax pieces over the class axis.  log_probs is
    # never materialized: logp[target] = shifted[target] - lse.
    x_max = jnp.max(x, axis=class_axis, keepdims=True)
    shifted = x - x_max
    lse = jnp.log(jnp.sum(jnp.exp(shifted), axis=class_axis, keepdims=True))

    class_ids = lax.broadcasted_iota(jnp.int32, x.shape, class_axis)
    onehot = (class_ids == t).astype(jnp.float32)
    x_t = jnp.sum(onehot * shifted, axis=class_axis, keepdims=True)
    logp_t = x_t - lse

    # F.cross_entropy(..., weight=w, reduction='none'): ce = -w[t] * logp[t]
    ce = -(w_t * logp_t)
    pt = jnp.exp(-ce)
    one_minus_pt = 1.0 - pt

    # (1 - pt) ** gamma: integer gamma -> repeated VALU multiply; otherwise
    # pow (EUP exp/log) on a clamped base.
    g = float(gamma)
    if g.is_integer() and g >= 0:
        mod = jnp.ones_like(ce)
        for _ in range(int(g)):
            mod = mod * one_minus_pt
    else:
        mod = jnp.power(jnp.maximum(one_minus_pt, 0.0), g)
    focal = mod * ce

    # Mask samples past N (padded tail of the last tile) with a select so
    # garbage in the pad can never leak NaN/Inf into the accumulator.  All
    # reductions above are per-sample (keepdims over the class axis), so pad
    # columns/rows never contaminate valid ones before this mask.
    sample_ids = step * tile + lax.broadcasted_iota(jnp.int32, focal.shape,
                                                    sample_axis)
    focal = jnp.where(sample_ids < n_total, focal, 0.0)

    # Vector partial sums each step; one cross-vreg reduce in the epilogue.
    acc_ref[...] += focal

    @pl.when(step == pl.num_programs(0) - 1)
    def _finalize():
        out_ref[...] = jnp.sum(acc_ref[...], axis=sample_axis, keepdims=True)


def focal_loss(logits, targets, weight=None, gamma=2.0, reduction="mean",
               tile=None):
    """Focal loss matching the PyTorch module's forward.

    logits : [N, C] float (f32 / bf16)
    targets: [N] int
    weight : optional [C] float class weights
    """
    n, c = logits.shape
    targets = targets.astype(jnp.int32)

    # Class-weight gather hoisted to the wrapper: O(N), streams with targets.
    if weight is None:
        w_t = jnp.ones((n,), jnp.float32)
    else:
        w_t = weight.astype(jnp.float32)[targets]

    lane_dense = c < 128

    if lane_dense:
        # Samples on the 128-lane axis: logits -> [C, N]; the softmax reduce
        # runs over the (short) sublane axis and every vreg is fully used.
        logits_in = logits.T                          # [C, N], native dtype
        targets_in = targets.reshape(1, n)
        wt_in = w_t.reshape(1, n)
        if tile is None:
            # Per-sample working set: double-buffered native input + targets
            # + w_t + ~5 live [C, tile] f32 temps + sublane-padded accumulator.
            per_sample = 2 * c * logits.dtype.itemsize + 16 + 20 * c + 32
            tile = (8 * 1024 * 1024) // per_sample
            tile = min(tile, 32768)
        tile = int(tile)
        if tile >= n:
            tile = n                                  # single full-extent block
        else:
            tile = max(128, (tile // 128) * 128)      # lane granularity
        num_tiles = _cdiv(n, tile)
        in_specs = [
            pl.BlockSpec((c, tile), lambda j: (0, j)),
            pl.BlockSpec((1, tile), lambda j: (0, j)),
            pl.BlockSpec((1, tile), lambda j: (0, j)),
        ]
        acc_shape = (1, tile)
        inputs = (logits_in, targets_in, wt_in)
    else:
        # C >= 128: classes already fill the lane axis; tile over rows.
        # TODO(synk): vocab-scale C would need an online softmax over a second
        # (arbitrary) class-axis grid; here a [tile, C] block must fit VMEM.
        logits_in = logits
        targets_in = targets.reshape(n, 1)
        wt_in = w_t.reshape(n, 1)
        if tile is None:
            per_sample = 2 * c * logits.dtype.itemsize + 16 + 20 * c + 32
            tile = (8 * 1024 * 1024) // per_sample
            tile = min(tile, 2048)
        tile = int(tile)
        pack = 16 if logits.dtype.itemsize == 2 else 8   # bf16 sublane packing
        if tile >= n:
            tile = n
        else:
            tile = max(pack, (tile // pack) * pack)
        num_tiles = _cdiv(n, tile)
        in_specs = [
            pl.BlockSpec((tile, c), lambda i: (i, 0)),
            pl.BlockSpec((tile, 1), lambda i: (i, 0)),
            pl.BlockSpec((tile, 1), lambda i: (i, 0)),
        ]
        acc_shape = (tile, 1)
        inputs = (logits_in, targets_in, wt_in)

    kernel = functools.partial(
        _focal_loss_kernel, gamma=float(gamma), n_total=n, tile=tile,
        lane_dense=lane_dense)

    total = pl.pallas_call(
        kernel,
        out_shape=jax.ShapeDtypeStruct((1, 1), jnp.float32),
        grid_spec=pltpu.PrefetchScalarGridSpec(
            num_scalar_prefetch=0,
            grid=(num_tiles,),
            in_specs=in_specs,
            out_specs=pl.BlockSpec((1, 1), lambda i: (0, 0)),
            scratch_shapes=[pltpu.VMEM(acc_shape, jnp.float32)],
        ),
        compiler_params=pltpu.CompilerParams(
            # Single reduction axis with a resident accumulator -> arbitrary.
            # (v7x follow-up: a leading CORE_PARALLEL split over both TCs.)
            dimension_semantics=("arbitrary",),
            vmem_limit_bytes=32 * 1024 * 1024,
        ),
    )(*inputs)

    total = total[0, 0]
    if reduction == "mean":
        return total / n
    elif reduction == "sum":
        return total
    else:
        raise NotImplementedError(
            "reduction='none' not implemented in the Pallas path")


def focal_loss_ref(logits, targets, weight=None, gamma=2.0, reduction="mean"):
    """Pure-JAX reference mirroring the PyTorch module."""
    logp = jax.nn.log_softmax(logits.astype(jnp.float32), axis=-1)
    logp_t = jnp.take_along_axis(
        logp, targets[:, None].astype(jnp.int32), axis=-1)[:, 0]
    if weight is None:
        w_t = jnp.ones_like(logp_t)
    else:
        w_t = weight.astype(jnp.float32)[targets]
    ce = -w_t * logp_t
    pt = jnp.exp(-ce)
    focal = (1.0 - pt) ** gamma * ce
    if reduction == "mean":
        return jnp.mean(focal)
    return jnp.sum(focal)


if __name__ == "__main__":
    key = jax.random.PRNGKey(0)
    k1, k2, k3, k4, k5, k6 = jax.random.split(key, 6)

    # Test 1: module-scale shapes (N=8 samples, C=4 classes), f32, weights,
    # lane-dense single-block path.
    N1, C1 = 8, 4
    logits1 = jax.random.normal(k1, (N1, C1), dtype=jnp.float32)
    targets1 = jax.random.randint(k2, (N1,), 0, C1, dtype=jnp.int32)
    weight1 = jnp.linspace(0.5, 1.5, C1, dtype=jnp.float32)

    out1 = jax.block_until_ready(focal_loss(logits1, targets1, weight1, gamma=2.0))
    ref1 = focal_loss_ref(logits1, targets1, weight1, gamma=2.0)
    assert jnp.allclose(out1, ref1, rtol=2e-5, atol=2e-5), (out1, ref1)

    # Non-integer gamma exercises the pow fallback path.
    out1b = jax.block_until_ready(focal_loss(logits1, targets1, weight1, gamma=1.5))
    ref1b = focal_loss_ref(logits1, targets1, weight1, gamma=1.5)
    assert jnp.allclose(out1b, ref1b, rtol=2e-5, atol=2e-5), (out1b, ref1b)

    # Test 2: lane-dense multi-tile grid + masked edge tile + bf16 DMA path.
    N2, C2 = 300, 4
    logits2 = jax.random.normal(k3, (N2, C2), dtype=jnp.float32).astype(jnp.bfloat16)
    targets2 = jax.random.randint(k4, (N2,), 0, C2, dtype=jnp.int32)
    weight2 = jnp.linspace(0.25, 2.0, C2, dtype=jnp.float32)

    out2 = jax.block_until_ready(
        focal_loss(logits2, targets2, weight2, gamma=2.0, tile=128))
    ref2 = focal_loss_ref(logits2, targets2, weight2, gamma=2.0)
    assert jnp.allclose(out2, ref2, rtol=1e-4, atol=1e-4), (out2, ref2)

    # Test 3: C >= 128 path (classes on lanes), multi-tile + masked edge,
    # no class weights, reduction='sum'.
    N3, C3 = 144, 256
    logits3 = jax.random.normal(k5, (N3, C3), dtype=jnp.float32)
    targets3 = jax.random.randint(k6, (N3,), 0, C3, dtype=jnp.int32)

    out3 = jax.block_until_ready(
        focal_loss(logits3, targets3, None, gamma=2.0, reduction="sum", tile=64))
    ref3 = focal_loss_ref(logits3, targets3, None, gamma=2.0, reduction="sum")
    assert jnp.allclose(out3, ref3, rtol=1e-4, atol=2e-4), (out3, ref3)

    print("KERNEL_OK")
</pallas_src>

<mosaic_0001>
module attributes {stable_mosaic.version = 11 : i64} {
  func.func @_focal_loss_kernel(%arg0: i32, %arg1: memref<4x8xf32, #tpu.memory_space<vmem>>, %arg2: memref<1x8xi32, #tpu.memory_space<vmem>>, %arg3: memref<1x8xf32, #tpu.memory_space<vmem>>, %arg4: memref<1x1xf32, #tpu.memory_space<vmem>>, %arg5: memref<1x8xf32, #tpu.memory_space<vmem>>) attributes {dimension_semantics = [#tpu.dimension_semantics<arbitrary>], iteration_bounds = array<i64: 1>, scalar_prefetch = 0 : i64, scratch_operands = 1 : i64, tpu.core_type = #tpu.core_type<tc>, window_params = [{transform_indices = @transform_0, window_bounds = array<i64: 4, 8>}, {transform_indices = @transform_1, window_bounds = array<i64: 1, 8>}, {transform_indices = @transform_2, window_bounds = array<i64: 1, 8>}, {pipeline_mode = #tpu.pipeline_mode<synchronous>, transform_indices = @transform_3, window_bounds = array<i64: 1, 1>}]} {
    %c0_i32 = arith.constant 0 : i32
    %0 = arith.cmpi eq, %arg0, %c0_i32 : i32
    %1 = arith.extui %0 : i1 to i32
    %c0_i32_0 = arith.constant 0 : i32
    %2 = arith.cmpi ne, %1, %c0_i32_0 : i32
    scf.if %2 {
      %cst_20 = arith.constant 0.000000e+00 : f32
      %49 = vector.broadcast %cst_20 : f32 to vector<1x8xf32>
      %c0_21 = arith.constant 0 : index
      %c0_22 = arith.constant 0 : index
      %50 = vector.load %arg5[%c0_21, %c0_22] : memref<1x8xf32, #tpu.memory_space<vmem>>, vector<1x8xf32>
      tpu.vector_store %arg5[%c0_21, %c0_22], %49 {strides = array<i32>} : memref<1x8xf32, #tpu.memory_space<vmem>>, vector<1x8xf32>,
      %cst_23 = arith.constant 0.000000e+00 : f32
      %51 = vector.broadcast %cst_23 : f32 to vector<1x1xf32>
      %c0_24 = arith.constant 0 : index
      %c0_25 = arith.constant 0 : index
      %52 = vector.load %arg4[%c0_24, %c0_25] : memref<1x1xf32, #tpu.memory_space<vmem>>, vector<1x1xf32>
      tpu.vector_store %arg4[%c0_24, %c0_25], %51 {strides = array<i32>} : memref<1x1xf32, #tpu.memory_space<vmem>>, vector<1x1xf32>,
    } else {
    }
    %c0 = arith.constant 0 : index
    %c0_1 = arith.constant 0 : index
    %3 = vector.load %arg1[%c0, %c0_1] : memref<4x8xf32, #tpu.memory_space<vmem>>, vector<4x8xf32>
    %c0_2 = arith.constant 0 : index
    %c0_3 = arith.constant 0 : index
    %4 = vector.load %arg2[%c0_2, %c0_3] : memref<1x8xi32, #tpu.memory_space<vmem>>, vector<1x8xi32>
    %c0_4 = arith.constant 0 : index
    %c0_5 = arith.constant 0 : index
    %5 = vector.load %arg3[%c0_4, %c0_5] : memref<1x8xf32, #tpu.memory_space<vmem>>, vector<1x8xf32>
    %cst = arith.constant dense<0xFF800000> : vector<8xf32>
    %6 = vector.multi_reduction <maximumf>, %3, %cst [0] : vector<4x8xf32> to vector<8xf32>
    %7 = vector.shape_cast %6 : vector<8xf32> to vector<1x8xf32>
    %8 = vector.broadcast %7 : vector<1x8xf32> to vector<4x8xf32>
    %9 = arith.subf %3, %8 : vector<4x8xf32>
    %10 = math.exp %9 : vector<4x8xf32>
    %cst_6 = arith.constant dense<0.000000e+00> : vector<8xf32>
    %11 = vector.multi_reduction <add>, %10, %cst_6 [0] : vector<4x8xf32> to vector<8xf32>
    %12 = vector.shape_cast %11 : vector<8xf32> to vector<1x8xf32>
    %13 = math.log %12 : vector<1x8xf32>
    %14 = tpu.iota {dimensions = array<i32: 0>} : vector<4x8xi32>
    %15 = vector.broadcast %4 : vector<1x8xi32> to vector<4x8xi32>
    %16 = arith.cmpi eq, %14, %15 : vector<4x8xi32>
    %17 = arith.extui %16 : vector<4x8xi1> to vector<4x8xi32>
    %18 = arith.sitofp %17 : vector<4x8xi32> to vector<4x8xf32>
    %19 = arith.mulf %18, %9 : vector<4x8xf32>
    %cst_7 = arith.constant dense<0.000000e+00> : vector<8xf32>
    %20 = vector.multi_reduction <add>, %19, %cst_7 [0] : vector<4x8xf32> to vector<8xf32>
    %21 = vector.shape_cast %20 : vector<8xf32> to vector<1x8xf32>
    %22 = arith.subf %21, %13 : vector<1x8xf32>
    %23 = arith.mulf %5, %22 : vector<1x8xf32>
    %cst_8 = arith.constant 0.000000e+00 : f32
    %24 = vector.broadcast %cst_8 : f32 to vector<1x8xf32>
    %25 = arith.subf %24, %23 : vector<1x8xf32>
    %cst_9 = arith.constant 0.000000e+00 : f32
    %26 = vector.broadcast %cst_9 : f32 to vector<1x8xf32>
    %27 = arith.subf %26, %25 : vector<1x8xf32>
    %28 = math.exp %27 : vector<1x8xf32>
    %cst_10 = arith.constant 1.000000e+00 : f32
    %29 = vector.broadcast %cst_10 : f32 to vector<1x8xf32>
    %30 = arith.subf %29, %28 : vector<1x8xf32>
    %cst_11 = arith.constant 1.000000e+00 : f32
    %31 = vector.broadcast %cst_11 : f32 to vector<1x8xf32>
    %32 = arith.mulf %31, %30 : vector<1x8xf32>
    %33 = arith.mulf %32, %30 : vector<1x8xf32>
    %34 = arith.mulf %33, %25 : vector<1x8xf32>
    %c8_i32 = arith.constant 8 : i32
    %35 = arith.muli %arg0, %c8_i32 : i32
    %36 = tpu.iota {dimensions = array<i32: 1>} : vector<1x8xi32>
    %37 = vector.broadcast %35 : i32 to vector<1x8xi32>
    %38 = arith.addi %37, %36 : vector<1x8xi32>
    %c8_i32_12 = arith.constant 8 : i32
    %39 = vector.broadcast %c8_i32_12 : i32 to vector<1x8xi32>
    %40 = arith.cmpi slt, %38, %39 : vector<1x8xi32>
    %cst_13 = arith.constant 0.000000e+00 : f32
    %41 = vector.broadcast %cst_13 : f32 to vector<1x8xf32>
    %42 = arith.select %40, %34, %41 : vector<1x8xi1>, vector<1x8xf32>
    %c0_14 = arith.constant 0 : index
    %c0_15 = arith.constant 0 : index
    %43 = vector.load %arg5[%c0_14, %c0_15] : memref<1x8xf32, #tpu.memory_space<vmem>>, vector<1x8xf32>
    %44 = arith.addf %43, %42 : vector<1x8xf32>
    %c0_16 = arith.constant 0 : index
    %c0_17 = arith.constant 0 : index
    %45 = vector.load %arg5[%c0_16, %c0_17] : memref<1x8xf32, #tpu.memory_space<vmem>>, vector<1x8xf32>
    tpu.vector_store %arg5[%c0_16, %c0_17], %44 {strides = array<i32>} : memref<1x8xf32, #tpu.memory_space<vmem>>, vector<1x8xf32>,
    %c0_i32_18 = arith.constant 0 : i32
    %46 = arith.cmpi eq, %arg0, %c0_i32_18 : i32
    %47 = arith.extui %46 : i1 to i32
    %c0_i32_19 = arith.constant 0 : i32
    %48 = arith.cmpi ne, %47, %c0_i32_19 : i32
    scf.if %48 {
      %c0_20 = arith.constant 0 : index
      %c0_21 = arith.constant 0 : index
      %49 = vector.load %arg5[%c0_20, %c0_21] : memref<1x8xf32, #tpu.memory_space<vmem>>, vector<1x8xf32>
      %cst_22 = arith.constant dense<0.000000e+00> : vector<1xf32>
      %50 = vector.multi_reduction <add>, %49, %cst_22 [1] : vector<1x8xf32> to vector<1xf32>
      %51 = vector.shape_cast %50 : vector<1xf32> to vector<1x1xf32>
      %c0_23 = arith.constant 0 : index
      %c0_24 = arith.constant 0 : index
      %52 = vector.load %arg4[%c0_23, %c0_24] : memref<1x1xf32, #tpu.memory_space<vmem>>, vector<1x1xf32>
      tpu.vector_store %arg4[%c0_23, %c0_24], %51 {strides = array<i32>} : memref<1x1xf32, #tpu.memory_space<vmem>>, vector<1x1xf32>,
    } else {
    }
    return
  }
  func.func @transform_0(%arg0: i32) -> (i32, i32) {
    %c0_i32 = arith.constant 0 : i32
    %c0_i32_0 = arith.constant 0 : i32
    return %c0_i32, %arg0 : i32, i32
  }
  func.func @transform_1(%arg0: i32) -> (i32, i32) {
    %c0_i32 = arith.constant 0 : i32
    %c0_i32_0 = arith.constant 0 : i32
    return %c0_i32, %arg0 : i32, i32
  }
  func.func @transform_2(%arg0: i32) -> (i32, i32) {
    %c0_i32 = arith.constant 0 : i32
    %c0_i32_0 = arith.constant 0 : i32
    return %c0_i32, %arg0 : i32, i32
  }
  func.func @transform_3(%arg0: i32) -> (i32, i32) {
    %c0_i32 = arith.constant 0 : i32
    %c0_i32_0 = arith.constant 0 : i32
    %c0_i32_1 = arith.constant 0 : i32
    return %c0_i32, %c0_i32_0 : i32, i32
  }
}

</mosaic_0001>

<bundles_post_ra>
// kernel: tpu_custom_call.1
= control target key start
LH: loop header
LB: loop body
LE: loop exit
PB: predicated region body
PF: predicated region fallthrough
CT: control target
= control target key end

     0   :  { %8 = vsyncpa [#allocation4], 0  ;;  %s267_s0 = inlined_call_operand.hbm [shape: f32[4,8], index: 0, kind: input, shape index: {}]   ;;  %s268_s1 = inlined_call_operand.hbm [shape: s32[1,8], index: 1, kind: input, shape index: {}]   ;;  %s269_s2 = inlined_call_operand.vmem [shape: f32[1,8], index: 2, kind: input, shape index: {}]   ;;  %s270_s3 = inlined_call_operand.hbm [shape: f32[1,1], index: 3, kind: output, shape index: {}]  }
   0x1   :  { %9 = vsyncpa [#allocation7], 0 }
   0x2   :  { %10 = vsyncpa [#allocation5], 0  ;;  %s16_s14 = sshll.u32 %s267_s0, 4  ;;  %s225_s15 = smov [#allocation3]   ;;  %s17_s14 = int_to_ptr.hbm [resolvable:$true] %s16_s14 }
   0x3   :  { %s18_s16 = sshll.u32 %s225_s15, 4  ;;  %s27_s19 = sshll.u32 %s268_s1, 4  ;;  %s19_s16 = int_to_ptr.vmem [resolvable:$true] %s18_s16  ;;  %s28_s19 = int_to_ptr.hbm [resolvable:$true] %s27_s19 }
   0x4   :  { %21 = dma.hbm_to_vmem [thread:$0]  %s17_s14, 64, %s19_s16, [#allocation4]  }
   0x5   :  { %s226_s20 = smov [#allocation6]  }
   0x6   :  { %s29_s21 = sshll.u32 %s226_s20, 4  ;;  %s30_s21 = int_to_ptr.vmem [resolvable:$true] %s29_s21 }
   0x7   :  { %32 = dma.hbm_to_vmem [thread:$0]  %s28_s19, 16, %s30_s21, [#allocation7]  }
   0x8   :  { %219 = dma.done.wait [#allocation4], 64  }
   0x9   :  { %220 = vsyncadd [#allocation4], 4294967232 }
   0xa   :  { %221 = dma.done.wait [#allocation7], 16  }
   0xb   :  { %222 = vsyncadd [#allocation7], 4294967280  ;;  %vm47_vm0 = vcmask 57344   ;;  %v227_v0 = vmov 0.0   ;;  %vm54_vm1 = vcmask 60416   ;;  %v74_v4 = vlaneseq  ;;  %s124_s25 = sshll.u32 %s270_s3, 4  ;;  %s125_s25 = int_to_ptr.hbm [resolvable:$true] %s124_s25 }
   0xc   :  { %48 = vst.msk [vmem:[#allocation2] sm:$0x1] %vm47_vm0, %v227_v0  ;;  %v51_v1 = vld [vmem:[#allocation3] sm:$0xf]  ;;  %v140_v8 = vld [vmem:[#allocation6] ss:$0 sm:$0xff] }
   0xd   :  { %v55_v2 = vsel %vm54_vm1, %v51_v1, -inf  ;;  %v75_v7 = vshrl.u32 %v74_v4, 7  ;;  %v53_v33 = vld [vmem:[%s269_s2] sm:$0x1]  ;;  %v99_v40 = vand.u32 127, %v74_v4  ;;  %vm49_vm4 = vcmask 0  }
   0xe   :  { %v56_v3 = vrot.slane %v55_v2, 4  ;;  %50 = vst.msk [vmem:[#allocation8] sm:$0x1] %vm49_vm4, %v227_v0  ;;  %s228_s2 = smov [#allocation8]  }
   0xf   :  { %vm77_vm2 = vcmp.eq.s32.totalorder %v75_v7, %v140_v8  ;;  %vm102_vm3 = vcmp.lt.s32.totalorder %v99_v40, 8  ;;  %s122_s22 = sshll.u32 %s228_s2, 4  ;;  %s123_s22 = int_to_ptr.vmem [resolvable:$true] %s122_s22 }
  0x10   :  { %v57_v5 = vmax.f32 %v55_v2, %v56_v3  ;;  %v135_v12 = vsel %vm77_vm2, 1.0, %v227_v0 }
  0x12   :  { %v58_v6 = vrot.slane %v57_v5, 2 }
  0x13   :  { %v104_v44 = vld [vmem:[#allocation2] sm:$0x1] }
  0x14   :  { %v59_v9 = vmax.f32 %v57_v5, %v58_v6 }
  0x16   :  { %v60_v10 = vrot.slane %v59_v9, 1 }
  0x18   :  { %v61_v11 = vmax.f32 %v59_v9, %v60_v10 }
  0x1a   :  { %v62_v13 = vsub.f32 %v51_v1, %v61_v11 }
  0x1c   :  { %v63_v14 = vmul.f32 1.442695, %v62_v13  ;;  %v80_v15 = vmul.f32 %v135_v12, %v62_v13 }
  0x1e   :  { %141 = vpow2.f32 %v63_v14  ;;  %v81_v16 = vsel %vm54_vm1, %v80_v15, 0.0 }
  0x1f   :  { %v82_v17 = vrot.slane %v81_v16, 4 }
  0x21   :  { %v83_v21 = vadd.f32 %v82_v17, %v81_v16 }
  0x23   :  { %v84_v24 = vrot.slane %v83_v21, 2 }
  0x24   :  { %v142_v18 = vpop.eup %141 }
  0x25   :  { %v65_v19 = vsel %vm54_vm1, %v142_v18, 0.0  ;;  %v85_v27 = vadd.f32 %v84_v24, %v83_v21 }
  0x26   :  { %v66_v20 = vrot.slane %v65_v19, 4 }
  0x27   :  { %v86_v29 = vrot.slane %v85_v27, 1 }
  0x28   :  { %v67_v22 = vadd.f32 %v66_v20, %v65_v19 }
  0x29   :  { %v87_v30 = vadd.f32 %v86_v29, %v85_v27 }
  0x2a   :  { %v68_v23 = vrot.slane %v67_v22, 2 }
  0x2c   :  { %v69_v25 = vadd.f32 %v68_v23, %v67_v22 }
  0x2e   :  { %v70_v26 = vrot.slane %v69_v25, 1 }
  0x30   :  { %v71_v28 = vadd.f32 %v70_v26, %v69_v25 }
  0x32   :  { %143 = vlog2.f32 %v71_v28 }
  0x38   :  { %v144_v31 = vpop.eup %143 }
  0x39   :  { %v73_v32 = vmul.f32 0.6931472, %v144_v31 }
  0x3b   :  { %v88_v34 = vsub.f32 %v87_v30, %v73_v32 }
  0x3d   :  { %v89_v35 = vmul.f32 %v88_v34, %v53_v33 }
  0x3f   :  { %v90_v36 = vsub.f32 0.0, %v89_v35 }
  0x41   :  { %v91_v37 = vsub.f32 0.0, %v90_v36 }
  0x43   :  { %v92_v38 = vmul.f32 1.442695, %v91_v37 }
  0x45   :  { %145 = vpow2.f32 %v92_v38 }
  0x4b   :  { %v146_v39 = vpop.eup %145 }
  0x4c   :  { %v94_v41 = vsub.f32 1.0, %v146_v39 }
  0x4e   :  { %v95_v42 = vmul.f32 %v94_v41, %v94_v41 }
  0x50   :  { %v96_v43 = vmul.f32 %v95_v42, %v90_v36 }
  0x52   :  { %v103_v45 = vsel %vm102_vm3, %v96_v43, 0.0 }
  0x53   :  { %v105_v46 = vadd.f32 %v104_v44, %v103_v45 }
  0x55   :  { %107 = vst.msk [vmem:[#allocation2] sm:$0x1] %vm47_vm0, %v105_v46 }
  0x5c   :  { %v111_v47 = vld [vmem:[#allocation2] sm:$0x1] }
  0x5d   :  { %v112_v48 = vsel %vm47_vm0, %v111_v47, 0.0 }
  0x5e   :  { %113 = vadd.xlane.f32.xlu0 %v112_v48 }
  0xd1   :  { %v114_v49 = vpop.xlane.xlu0 %113 }
  0xd2   :  { %116 = vst.msk [vmem:[#allocation8] sm:$0x1] %vm49_vm4, %v114_v49 }
  0xd3   :  { %127 = dma.vmem_to_hbm [thread:$0]  %s123_s22, 16, %s125_s25, [#allocation5]  }
  0xd4   :  { %223 = dma.done.wait [#allocation5], 16  }
  0xd5   :  { %224 = vsyncadd [#allocation5], 4294967280 }
  0xd6   :  { %132 = vsyncpa [#allocation4], 1 }
  0xd7   :  { %133 = vsyncpa [#allocation7], 1 }
  0xd8   :  { %134 = vsyncpa [#allocation5], 1 }

</bundles_post_ra>
